<compile_context>
chip_gen: v7x
topology: tpu7x:2x2x1
jax: 0.10.0
libtpu: 0.0.40
codegen_flags: <defaults>
</compile_context>

<pallas_src>
import functools

import jax
import jax.numpy as jnp
from jax.experimental import pallas as pl
from jax.experimental.pallas import tpu as pltpu


def _round_up(x, m):
    return -(-x // m) * m


def _quantile_loss_kernel(preds_ref, target_ref, out_ref, acc_ref, *,
                          quantiles, tile_c, chunk, c_valid, tiles_per_split):
    ci = pl.program_id(0)           # split index (per-core partial sum)
    ti = pl.program_id(1)           # packed-column tile index within the split

    @pl.when(ti == 0)
    def _init():
        acc_ref[...] = jnp.zeros_like(acc_ref)

    # First (unclamped) global packed column covered by this tile.
    base = (ci * tiles_per_split + ti) * tile_c

    lane = jax.lax.broadcasted_iota(jnp.int32, (8, chunk), 1)

    # Chunked, in-register accumulation: intermediates stay within a few vregs.
    acc = jnp.zeros((8, chunk), jnp.float32)
    for g in range(tile_c // chunk):
        lo = g * chunk
        t = target_ref[:, lo:lo + chunk].astype(jnp.float32)      # (8, chunk)
        s = None
        for qi, q in enumerate(quantiles):
            p = preds_ref[qi * 8:(qi + 1) * 8, lo:lo + chunk].astype(jnp.float32)
            e = t - p
            pin = q * e - jnp.minimum(e, 0.0)      # == max((q-1)*e, q*e)
            s = pin if s is None else s + pin
        # Mask columns beyond the real data (block overhang past N/8 and
        # clamped out-of-range tiles).  The mask sits right next to the
        # accumulate so overhang garbage (possibly NaN/Inf) never reaches a sum.
        valid = (base + lo + lane) < c_valid
        acc = acc + jnp.where(valid, s, 0.0)

    # Deferred reduction into a single-vreg accumulator.
    acc_ref[...] += jnp.sum(acc, axis=1, keepdims=True)

    @pl.when(ti == pl.num_programs(1) - 1)
    def _finalize():
        out_ref[...] = jnp.sum(acc_ref[...]).reshape(1, 1, 1)


def quantile_loss(preds, target, quantiles, *, tile_cols=65536, num_splits=1,
                  core_parallel=False):
    """Pallas-TPU equivalent of QuantileLoss.forward(preds, target).

    preds: (N, Q); target: (N,).  Returns a float32 scalar:
    mean over samples of the per-sample sum of pinball losses.
    """
    n, n_q = preds.shape
    assert len(quantiles) == n_q
    if target.ndim == 2:
        # TODO(synk): the torch module's literal 2-D-target path broadcasts
        # (N,1,1)-(N,) into an (N,1,N) outer difference; that degenerate path
        # is not replicated -- an (N, 1) target is treated as (N,).
        assert target.shape == (n, 1)
        target = target[:, 0]
    assert target.shape == (n,)

    quantiles = tuple(float(q) for q in quantiles)

    # --- one fused pack pass: preds (N, Q) -> (Q*8, N/8); target -> (8, N/8) --
    pad = (-n) % 8
    preds_p, target_p = preds, target
    if pad:
        # Zero padding => errors == 0 => pinball == 0: padded samples add 0.
        preds_p = jnp.pad(preds, ((0, pad), (0, 0)))
        target_p = jnp.pad(target, ((0, pad),))
    n_pad = n + pad
    c_total = n_pad // 8
    packed = preds_p.reshape(8, c_total, n_q).transpose(2, 0, 1)
    packed = packed.reshape(n_q * 8, c_total)      # single XLA copy pass
    target2 = target_p.reshape(8, c_total)         # free (bitcast) when pad==0

    # --- tiling ---------------------------------------------------------------
    tile_c = max(128, min(int(tile_cols), _round_up(c_total, 128)))
    tile_c = _round_up(tile_c, 128)
    if tile_c >= 512:
        tile_c = _round_up(tile_c, 512)
    chunk = min(512, tile_c)

    n_tiles = -(-c_total // tile_c)
    splits = max(1, min(int(num_splits), n_tiles))
    tiles_per_split = -(-n_tiles // splits)

    def _col_block(ci, ti):
        # Clamp so the DMA never targets a block past the array; out-of-range
        # tiles are fully masked inside the kernel and contribute 0.
        t = ci * tiles_per_split + ti
        return (0, jnp.minimum(t, n_tiles - 1))

    kernel = functools.partial(
        _quantile_loss_kernel, quantiles=quantiles, tile_c=tile_c,
        chunk=chunk, c_valid=c_total, tiles_per_split=tiles_per_split)

    p_bytes = n_q * 8 * tile_c * packed.dtype.itemsize
    t_bytes = 8 * tile_c * target2.dtype.itemsize
    vmem_limit = int(min(max(2 * (p_bytes + t_bytes) + (4 << 20), 32 << 20),
                         100 << 20))

    # v7x: pass num_splits=2, core_parallel=True to shard across both cores.
    sem0 = pltpu.CORE_PARALLEL if (core_parallel and splits > 1) else "parallel"

    partials = pl.pallas_call(
        kernel,
        out_shape=jax.ShapeDtypeStruct((splits, 1, 1), jnp.float32),
        grid_spec=pltpu.PrefetchScalarGridSpec(
            num_scalar_prefetch=0,
            grid=(splits, tiles_per_split),
            in_specs=[
                pl.BlockSpec((n_q * 8, tile_c), _col_block),   # packed preds
                pl.BlockSpec((8, tile_c), _col_block),         # packed target
            ],
            out_specs=pl.BlockSpec((1, 1, 1), lambda ci, ti: (ci, 0, 0)),
            scratch_shapes=[pltpu.VMEM((8, 1), jnp.float32)],
        ),
        compiler_params=pltpu.CompilerParams(
            dimension_semantics=(sem0, "arbitrary"),
            vmem_limit_bytes=vmem_limit),
        cost_estimate=pl.CostEstimate(
            flops=6 * n * n_q,
            transcendentals=0,
            bytes_accessed=int(preds.size * preds.dtype.itemsize
                               + target.size * target.dtype.itemsize + 4)),
    )(packed, target2)

    # torch.mean over the N per-sample quantile-sums (divide by the true N).
    return jnp.sum(partials) / jnp.float32(n)


if __name__ == "__main__":
    key = jax.random.PRNGKey(0)
    k1, k2, k3, k4 = jax.random.split(key, 4)

    quantiles = (0.1, 0.5, 0.9)

    def ref_loss(p, t):
        # Plain-JAX reference with identical semantics to the PyTorch module.
        e = t[:, None] - p
        qv = jnp.asarray(quantiles, dtype=jnp.float32)[None, :]
        return jnp.mean(jnp.sum(jnp.maximum((qv - 1.0) * e, qv * e), axis=1))

    # Small shapes consistent with the module: N samples x Q quantiles.
    N, Q = 200, len(quantiles)
    preds = jax.random.normal(k1, (N, Q), dtype=jnp.float32)
    target = jax.random.normal(k2, (N,), dtype=jnp.float32)

    loss = jax.block_until_ready(quantile_loss(preds, target, quantiles))
    ref = ref_loss(preds, target)
    assert jnp.allclose(loss, ref, rtol=1e-4, atol=1e-5), (loss, ref)

    # Ragged / multi-tile / multi-split path: exercises the pad-to-8 path,
    # the boundary column mask and the per-split tile clamping.
    N2 = 4099
    preds2 = jax.random.normal(k3, (N2, Q), dtype=jnp.float32)
    target2 = jax.random.normal(k4, (N2,), dtype=jnp.float32)
    loss2 = jax.block_until_ready(
        quantile_loss(preds2, target2, quantiles, tile_cols=128, num_splits=2))
    ref2 = ref_loss(preds2, target2)
    assert jnp.allclose(loss2, ref2, rtol=1e-4, atol=1e-5), (loss2, ref2)

    print("KERNEL_OK")
</pallas_src>

<mosaic_0001>
module attributes {stable_mosaic.version = 11 : i64} {
  func.func @_quantile_loss_kernel(%arg0: i32, %arg1: i32, %arg2: memref<24x128xf32, #tpu.memory_space<vmem>>, %arg3: memref<8x128xf32, #tpu.memory_space<vmem>>, %arg4: memref<1x1x1xf32, #tpu.memory_space<vmem>>, %arg5: memref<8x1xf32, #tpu.memory_space<vmem>>) attributes {dimension_semantics = [#tpu.dimension_semantics<parallel>, #tpu.dimension_semantics<arbitrary>], iteration_bounds = array<i64: 1, 1>, scalar_prefetch = 0 : i64, scratch_operands = 1 : i64, tpu.core_type = #tpu.core_type<tc>, window_params = [{transform_indices = @transform_0, window_bounds = array<i64: 24, 128>}, {transform_indices = @transform_1, window_bounds = array<i64: 8, 128>}, {transform_indices = @transform_2, window_bounds = array<i64: 1, 1, 1>}]} {
    %c0_i32 = arith.constant 0 : i32
    %0 = arith.cmpi eq, %arg1, %c0_i32 : i32
    %1 = arith.extui %0 : i1 to i32
    %c0_i32_0 = arith.constant 0 : i32
    %2 = arith.cmpi ne, %1, %c0_i32_0 : i32
    scf.if %2 {
      %cst_21 = arith.constant 0.000000e+00 : f32
      %48 = vector.broadcast %cst_21 : f32 to vector<8x1xf32>
      %c0_22 = arith.constant 0 : index
      %c0_23 = arith.constant 0 : index
      %49 = vector.load %arg5[%c0_22, %c0_23] : memref<8x1xf32, #tpu.memory_space<vmem>>, vector<8x1xf32>
      tpu.vector_store %arg5[%c0_22, %c0_23], %48 {strides = array<i32>} : memref<8x1xf32, #tpu.memory_space<vmem>>, vector<8x1xf32>,
    } else {
    }
    %c1_i32 = arith.constant 1 : i32
    %3 = arith.muli %arg0, %c1_i32 : i32
    %4 = arith.addi %3, %arg1 : i32
    %c128_i32 = arith.constant 128 : i32
    %5 = arith.muli %4, %c128_i32 : i32
    %6 = tpu.iota {dimensions = array<i32: 1>} : vector<8x128xi32>
    %cst = arith.constant 0.000000e+00 : f32
    %7 = vector.broadcast %cst : f32 to vector<8x128xf32>
    %c0 = arith.constant 0 : index
    %c0_1 = arith.constant 0 : index
    %8 = vector.load %arg3[%c0, %c0_1] : memref<8x128xf32, #tpu.memory_space<vmem>>, vector<8x128xf32>
    %c0_2 = arith.constant 0 : index
    %c0_3 = arith.constant 0 : index
    %9 = vector.load %arg2[%c0_2, %c0_3] : memref<24x128xf32, #tpu.memory_space<vmem>>, vector<8x128xf32>
    %10 = arith.subf %8, %9 : vector<8x128xf32>
    %cst_4 = arith.constant 1.000000e-01 : f32
    %11 = vector.broadcast %cst_4 : f32 to vector<8x128xf32>
    %12 = arith.mulf %11, %10 : vector<8x128xf32>
    %cst_5 = arith.constant 0.000000e+00 : f32
    %13 = vector.broadcast %cst_5 : f32 to vector<8x128xf32>
    %14 = arith.minimumf %10, %13 : vector<8x128xf32>
    %15 = arith.subf %12, %14 : vector<8x128xf32>
    %c8 = arith.constant 8 : index
    %c0_6 = arith.constant 0 : index
    %16 = vector.load %arg2[%c8, %c0_6] : memref<24x128xf32, #tpu.memory_space<vmem>>, vector<8x128xf32>
    %17 = arith.subf %8, %16 : vector<8x128xf32>
    %cst_7 = arith.constant 5.000000e-01 : f32
    %18 = vector.broadcast %cst_7 : f32 to vector<8x128xf32>
    %19 = arith.mulf %18, %17 : vector<8x128xf32>
    %cst_8 = arith.constant 0.000000e+00 : f32
    %20 = vector.broadcast %cst_8 : f32 to vector<8x128xf32>
    %21 = arith.minimumf %17, %20 : vector<8x128xf32>
    %22 = arith.subf %19, %21 : vector<8x128xf32>
    %23 = arith.addf %15, %22 : vector<8x128xf32>
    %c16 = arith.constant 16 : index
    %c0_9 = arith.constant 0 : index
    %24 = vector.load %arg2[%c16, %c0_9] : memref<24x128xf32, #tpu.memory_space<vmem>>, vector<8x128xf32>
    %25 = arith.subf %8, %24 : vector<8x128xf32>
    %cst_10 = arith.constant 0.899999976 : f32
    %26 = vector.broadcast %cst_10 : f32 to vector<8x128xf32>
    %27 = arith.mulf %26, %25 : vector<8x128xf32>
    %cst_11 = arith.constant 0.000000e+00 : f32
    %28 = vector.broadcast %cst_11 : f32 to vector<8x128xf32>
    %29 = arith.minimumf %25, %28 : vector<8x128xf32>
    %30 = arith.subf %27, %29 : vector<8x128xf32>
    %31 = arith.addf %23, %30 : vector<8x128xf32>
    %c0_i32_12 = arith.constant 0 : i32
    %32 = arith.addi %5, %c0_i32_12 : i32
    %33 = vector.broadcast %32 : i32 to vector<8x128xi32>
    %34 = arith.addi %33, %6 : vector<8x128xi32>
    %c25_i32 = arith.constant 25 : i32
    %35 = vector.broadcast %c25_i32 : i32 to vector<8x128xi32>
    %36 = arith.cmpi slt, %34, %35 : vector<8x128xi32>
    %cst_13 = arith.constant 0.000000e+00 : f32
    %37 = vector.broadcast %cst_13 : f32 to vector<8x128xf32>
    %38 = arith.select %36, %31, %37 : vector<8x128xi1>, vector<8x128xf32>
    %39 = arith.addf %7, %38 : vector<8x128xf32>
    %c0_14 = arith.constant 0 : index
    %c0_15 = arith.constant 0 : index
    %40 = vector.load %arg5[%c0_14, %c0_15] : memref<8x1xf32, #tpu.memory_space<vmem>>, vector<8x1xf32>
    %cst_16 = arith.constant dense<0.000000e+00> : vector<8xf32>
    %41 = vector.multi_reduction <add>, %39, %cst_16 [1] : vector<8x128xf32> to vector<8xf32>
    %42 = vector.shape_cast %41 : vector<8xf32> to vector<8x1xf32>
    %43 = arith.addf %40, %42 : vector<8x1xf32>
    %c0_17 = arith.constant 0 : index
    %c0_18 = arith.constant 0 : index
    %44 = vector.load %arg5[%c0_17, %c0_18] : memref<8x1xf32, #tpu.memory_space<vmem>>, vector<8x1xf32>
    tpu.vector_store %arg5[%c0_17, %c0_18], %43 {strides = array<i32>} : memref<8x1xf32, #tpu.memory_space<vmem>>, vector<8x1xf32>,
    %c0_i32_19 = arith.constant 0 : i32
    %45 = arith.cmpi eq, %arg1, %c0_i32_19 : i32
    %46 = arith.extui %45 : i1 to i32
    %c0_i32_20 = arith.constant 0 : i32
    %47 = arith.cmpi ne, %46, %c0_i32_20 : i32
    scf.if %47 {
      %c0_21 = arith.constant 0 : index
      %c0_22 = arith.constant 0 : index
      %48 = vector.load %arg5[%c0_21, %c0_22] : memref<8x1xf32, #tpu.memory_space<vmem>>, vector<8x1xf32>
      %49 = vector.shape_cast %48 : vector<8x1xf32> to vector<1x8x1xf32>
      %cst_23 = arith.constant dense<0.000000e+00> : vector<1xf32>
      %50 = vector.multi_reduction <add>, %49, %cst_23 [1, 2] : vector<1x8x1xf32> to vector<1xf32>
      %51 = vector.shape_cast %50 : vector<1xf32> to vector<1x1x1xf32>
      %52 = vector.extract %51[0, 0, 0] : f32 from vector<1x1x1xf32>
      %53 = vector.broadcast %52 : f32 to vector<1x1x1xf32>
      %c0_24 = arith.constant 0 : index
      %c0_25 = arith.constant 0 : index
      %c0_26 = arith.constant 0 : index
      %54 = vector.load %arg4[%c0_24, %c0_25, %c0_26] : memref<1x1x1xf32, #tpu.memory_space<vmem>>, vector<1x1x1xf32>
      tpu.vector_store %arg4[%c0_24, %c0_25, %c0_26], %53 {strides = array<i32>} : memref<1x1x1xf32, #tpu.memory_space<vmem>>, vector<1x1x1xf32>,
    } else {
    }
    return
  }
  func.func @transform_0(%arg0: i32, %arg1: i32) -> (i32, i32) {
    %c1_i32 = arith.constant 1 : i32
    %0 = arith.muli %arg0, %c1_i32 : i32
    %1 = arith.addi %0, %arg1 : i32
    %c0_i32 = arith.constant 0 : i32
    %2 = arith.minsi %1, %c0_i32 : i32
    %c0_i32_0 = arith.constant 0 : i32
    %c0_i32_1 = arith.constant 0 : i32
    return %c0_i32_0, %2 : i32, i32
  }
  func.func @transform_1(%arg0: i32, %arg1: i32) -> (i32, i32) {
    %c1_i32 = arith.constant 1 : i32
    %0 = arith.muli %arg0, %c1_i32 : i32
    %1 = arith.addi %0, %arg1 : i32
    %c0_i32 = arith.constant 0 : i32
    %2 = arith.minsi %1, %c0_i32 : i32
    %c0_i32_0 = arith.constant 0 : i32
    %c0_i32_1 = arith.constant 0 : i32
    return %c0_i32_0, %2 : i32, i32
  }
  func.func @transform_2(%arg0: i32, %arg1: i32) -> (i32, i32, i32) {
    %c0_i32 = arith.constant 0 : i32
    %c0_i32_0 = arith.constant 0 : i32
    %c0_i32_1 = arith.constant 0 : i32
    return %arg0, %c0_i32, %c0_i32_0 : i32, i32, i32
  }
}

</mosaic_0001>

<bundles_post_ra>
// kernel: tpu_custom_call.1
= control target key start
LH: loop header
LB: loop body
LE: loop exit
PB: predicated region body
PF: predicated region fallthrough
CT: control target
= control target key end

     0   :  { %7 = vsyncpa [#allocation4], 0  ;;  %s270_s0 = inlined_call_operand.hbm [shape: f32[24,25], index: 0, kind: input, shape index: {}]   ;;  %s271_s1 = inlined_call_operand.hbm [shape: f32[8,25], index: 1, kind: input, shape index: {}]   ;;  %s272_s2 = inlined_call_operand.hbm [shape: f32[1,1,1], index: 2, kind: output, shape index: {}]  }
   0x1   :  { %8 = vsyncpa [#allocation7], 0 }
   0x2   :  { %9 = vsyncpa [#allocation5], 0  ;;  %s210_s9 = smov [#allocation3]   ;;  %s138_s13 = scalar_lea.hbm %s270_s0, 384 }
   0x3   :  { %s20_s10 = sshll.u32 %s210_s9, 4  ;;  %p139_p0 = scmp.ne.s32.totalorder %s270_s0, %s138_s13  ;;  %s21_s10 = int_to_ptr.vmem [resolvable:$true] %s20_s10 }
   0x4   :  { %p142_p1 = scmp.lt.u32.totalorder %s138_s13, %s270_s0 }
   0x6   :  { %p144_p2 = pnand %p142_p1, %p139_p0 }
   0x8   :  { %147 = shalt.err (!%p144_p2)
}
   0x9   :  { %s148_s18 = scalar_lea.vmem %s21_s10, 384  ;;  %p153_p4 = scmp.lt.s32.totalorder %s21_s10, %s21_s10 }
   0xa   :  { %p149_p3 = scmp.ne.s32.totalorder %s21_s10, %s148_s18  ;;  %p154_p5 = scmp.lt.s32.totalorder %s148_s18, %s148_s18 }
   0xc   :  { %p155_p6 = por %p154_p5, %p153_p4 }
   0xe   :  { %p156_p7 = pnand %p155_p6, %p149_p3 }
  0x10   :  { %159 = shalt.err (!%p156_p7)
}
  0x11   :  { %s211_s19 = smov 128   ;;  %s212_s20 = smov 8  }
  0x12   :  { %26 = dma.hbm_to_vmem [thread:$0]  %s270_s0, 384, %s21_s10, [#allocation4], %s211_s19, %s211_s19, %s212_s20  }
  0x13   :  { %s213_s23 = smov [#allocation6]   ;;  %s160_s27 = scalar_lea.hbm %s271_s1, 128 }
  0x14   :  { %s38_s24 = sshll.u32 %s213_s23, 4  ;;  %p161_p8 = scmp.ne.s32.totalorder %s271_s1, %s160_s27  ;;  %s39_s24 = int_to_ptr.vmem [resolvable:$true] %s38_s24 }
  0x15   :  { %p164_p9 = scmp.lt.u32.totalorder %s160_s27, %s271_s1 }
  0x17   :  { %p166_p10 = pnand %p164_p9, %p161_p8 }
  0x19   :  { %169 = shalt.err (!%p166_p10)
}
  0x1a   :  { %s170_s4 = scalar_lea.vmem %s39_s24, 128  ;;  %p175_p12 = scmp.lt.s32.totalorder %s39_s24, %s39_s24 }
  0x1b   :  { %p171_p11 = scmp.ne.s32.totalorder %s39_s24, %s170_s4  ;;  %p176_p13 = scmp.lt.s32.totalorder %s170_s4, %s170_s4 }
  0x1d   :  { %p177_p0 = por %p176_p13, %p175_p12 }
  0x1f   :  { %p178_p1 = pnand %p177_p0, %p171_p11 }
  0x21   :  { %181 = shalt.err (!%p178_p1)
}
  0x22   :  { %41 = dma.hbm_to_vmem [thread:$0]  %s271_s1, 128, %s39_s24, [#allocation7]  }
  0x23   :  { %204 = dma.done.wait [#allocation4], 384  }
  0x24   :  { %205 = vsyncadd [#allocation4], 4294966912 }
  0x25   :  { %206 = dma.done.wait [#allocation7], 128  }
  0x26   :  { %207 = vsyncadd [#allocation7], 4294967168  ;;  %vm58_vm0 = vcmask 7168   ;;  %v214_v0 = vmov 0.0   ;;  %v62_v1 = vlaneseq  ;;  %v64_v2 = vld [vmem:[#allocation6] sm:$0xff]  ;;  %v65_v3 = vld [vmem:[#allocation3] sm:$0xff] }
  0x27   :  { %59 = vst.msk [vmem:[#allocation2] sm:$0xff] %vm58_vm0, %v214_v0  ;;  %v70_v4 = vld [vmem:[#allocation3 + $0x8] sm:$0xff]  ;;  %v66_v5 = vsub.f32 %v64_v2, %v65_v3  ;;  %v76_v7 = vld [vmem:[#allocation3 + $0x10] sm:$0xff]  ;;  %s215_s1 = smov [#allocation8]   ;;  %vm108_vm2 = vcmask 0  }
  0x28   :  { %v71_v6 = vsub.f32 %v64_v2, %v70_v4  ;;  %v77_v8 = vsub.f32 %v64_v2, %v76_v7  ;;  %v63_v13 = vand.u32 127, %v62_v1  ;;  %s116_s6 = sshll.u32 %s215_s1, 4  ;;  %s117_s6 = int_to_ptr.vmem [resolvable:$true] %s116_s6 }
  0x29   :  { %v67_v9 = vmul.f32 0.1, %v66_v5  ;;  %v68_v10 = vmin.f32 %v66_v5, 0.0  ;;  %s182_s8 = scalar_lea.vmem %s117_s6, 16  ;;  %s186_s9 = scalar_lea.vmem %s117_s6, 32 }
  0x2a   :  { %v72_v11 = vmul.f32 0.5, %v71_v6  ;;  %v73_v12 = vmin.f32 %v71_v6, 0.0  ;;  %v78_v14 = vmul.f32 0.9, %v77_v8  ;;  %v79_v15 = vmin.f32 %v77_v8, 0.0  ;;  %p183_p2 = scmp.ne.s32.totalorder %s117_s6, %s182_s8  ;;  %p187_p3 = scmp.lt.s32.totalorder %s117_s6, %s117_s6 }
  0x2b   :  { %v69_v16 = vsub.f32 %v67_v9, %v68_v10  ;;  %vm84_vm1 = vcmp.lt.s32.totalorder %v63_v13, 25  ;;  %p188_p4 = scmp.lt.s32.totalorder %s186_s9, %s182_s8 }
  0x2c   :  { %v74_v17 = vsub.f32 %v72_v11, %v73_v12  ;;  %v80_v18 = vsub.f32 %v78_v14, %v79_v15 }
  0x2d   :  { %p189_p5 = por %p188_p4, %p187_p3 }
  0x2e   :  { %v75_v19 = vadd.f32 %v74_v17, %v69_v16  ;;  %v87_v22 = vld [vmem:[#allocation2] sm:$0xff] }
  0x2f   :  { %p190_p6 = pnand %p189_p5, %p183_p2 }
  0x30   :  { %v81_v20 = vadd.f32 %v80_v18, %v75_v19 }
  0x32   :  { %v85_v21 = vsel %vm84_vm1, %v81_v20, 0.0 }
  0x33   :  { %88 = vadd.xlane.f32.xlu0 %v85_v21 }
  0xc0   :  { %v89_v23 = vpop.xlane.xlu0 %88 }
  0xc1   :  { %v90_v24 = vadd.f32 %v89_v23, %v87_v22 }
  0xc3   :  { %92 = vst.msk [vmem:[#allocation2] sm:$0xff] %vm58_vm0, %v90_v24 }
  0xca   :  { %v96_v25 = vld [vmem:[#allocation2] sm:$0xff] }
  0xcb   :  { %v97_v26 = vsel %vm58_vm0, %v96_v25, 0.0 }
  0xcc   :  { %98 = vadd.xlane.f32.xlu0 %v97_v26 }
 0x159   :  { %v99_v27 = vpop.xlane.xlu0 %98 }
 0x15a   :  { %v100_v28 = vrot.slane %v99_v27, 4 }
 0x15c   :  { %v101_v29 = vadd.f32 %v100_v28, %v99_v27 }
 0x15e   :  { %v102_v30 = vrot.slane %v101_v29, 2 }
 0x160   :  { %v103_v31 = vadd.f32 %v102_v30, %v101_v29 }
 0x162   :  { %v104_v32 = vrot.slane %v103_v31, 1 }
 0x164   :  { %v105_v33 = vadd.f32 %v104_v32, %v103_v31 }
 0x166   :  { %130 = vpush %v105_v33 }
 0x197   :  { %s131_s7 = spop %130 }
 0x198   :  { %v107_v34 = vstv %s131_s7 }
 0x199   :  { %109 = vst.msk [vmem:[#allocation8] sm:$0x1] %vm108_vm2, %v107_v34 }
 0x19a   :  { %193 = shalt.err (!%p190_p6)
}
 0x19b   :  { %s194_s12 = scalar_lea.hbm %s272_s2, 16 }
 0x19c   :  { %p195_p7 = scmp.ne.s32.totalorder %s272_s2, %s194_s12  ;;  %p198_p8 = scmp.lt.u32.totalorder %s194_s12, %s272_s2 }
 0x19e   :  { %p200_p9 = pnand %p198_p8, %p195_p7 }
 0x1a0   :  { %203 = shalt.err (!%p200_p9)
}
 0x1a1   :  { %119 = dma.vmem_to_hbm [thread:$0]  %s117_s6, 16, %s272_s2, [#allocation5]  }
 0x1a2   :  { %208 = dma.done.wait [#allocation5], 16  }
 0x1a3   :  { %209 = vsyncadd [#allocation5], 4294967280 }
 0x1a4   :  { %123 = vsyncpa [#allocation4], 1 }
 0x1a5   :  { %124 = vsyncpa [#allocation7], 1 }
 0x1a6   :  { %125 = vsyncpa [#allocation5], 1 }

</bundles_post_ra>
